<compile_context>
chip_gen: v6e
topology: v6e:2x2x1
jax: 0.10.0
libtpu: 0.0.40
codegen_flags: <defaults>
</compile_context>

<pallas_src>
import numpy as np
from math import sqrt

import jax
import jax.numpy as jnp
from jax.experimental import pallas as pl
from jax.experimental.pallas import tpu as pltpu

# ----------------------------- hyper-parameters -----------------------------
WINDOW_CONTEXT = 5          # context words per example (fixed by the module)
WORD_LEN = 20               # CharsVocab.WORD_LEN
EMBED_DIM = 50              # word embedding (implied by linear_dims)
CHAR_EMBED_DIM = 30         # char embedding (implied by linear_dims)
FILTER_NUM = 20             # filters per conv group
WINDOW_SIZE = 3             # conv kernel size -> linear in-dim 315
PAD = 2                     # Conv2d padding
HIDDEN_DIM = 32
NUM_LABELS = 8
VOCAB_SIZE = 100
CHARS_NUM = 40
PAD_CHAR_IDX = 0

BATCH = 8                   # total examples (all packed into one grid step)

H_PAD = WORD_LEN + 2 * PAD                 # 24
W_PAD = CHAR_EMBED_DIM + 2 * PAD           # 34
CONV_W = W_PAD - WINDOW_SIZE + 1           # 32 conv output columns
POOL_W = CONV_W - WORD_LEN + 1             # 13 pooled columns per group
ROWS = FILTER_NUM * WORD_LEN               # 400 (only rows h < 20 feed the pool)
K_IM2COL = WINDOW_SIZE * H_PAD             # 72  (3 shifts stacked along K)
K_DIM = K_IM2COL + 1                       # 73  (+ ones row for the folded bias)
N_LANES = BATCH * CONV_W                   # 256 (batch folded into lanes)
FEAT_WORD = WINDOW_CONTEXT * EMBED_DIM     # 250
PER_CTX = POOL_W + EMBED_DIM               # 63
FEAT_DIM = WINDOW_CONTEXT * PER_CTX        # 315 == linear_dims[3]
MAX_SHIFTS = (1, 2, 4, 8, 4)               # cumulative windows 2,4,8,16,20
assert FEAT_DIM == 315


# ------------------------- roll direction probe ------------------------------
def _roll_matches_jnp():
    """One-shot probe: True iff pltpu.roll follows jnp.roll convention
    (out[..., p] == x[..., p - shift]).  Makes the sliding-max shift amounts
    provably correct regardless of the rotate-op sign convention."""
    def k(x_ref, o_ref):
        o_ref[...] = pltpu.roll(x_ref[...], 1, axis=1)
    x = jnp.arange(N_LANES, dtype=jnp.float32).reshape(1, N_LANES)
    out = pl.pallas_call(
        k, out_shape=jax.ShapeDtypeStruct((1, N_LANES), jnp.float32))(x)
    return bool(out[0, 0] == jnp.float32(N_LANES - 1))


# --------------------------------- kernel -----------------------------------
def make_kernel(roll_like_jnp: bool):
    # we want rolled[p] = m[(p + k) mod N]; pick shift per roll convention
    shifts = tuple((N_LANES - k) if roll_like_jnp else k for k in MAX_SHIFTS)

    def cnn_mlp_kernel(rhs_ref, wemb_ref, segmask_ref, convmat_ref, q_ref,
                       w1w_ref, b1_ref, w2_ref, b2_ref, out_ref):
        """rhs_ref    : (5, 73, 256) bf16  im2col conv RHS, lane = b*32 + w,
                                           last K row = 1.0 (folded bias)
           wemb_ref   : (8, 250)    bf16  flattened word embeddings
           segmask_ref: (8, 256)    f32   segmask[b, l] = 1 iff l // 32 == b
           convmat_ref: (5, 400, 73) bf16 banded grouped-conv weights + bias col
           q_ref      : (5, 256, 32) bf16 linear1 pooled rows, zero-padded
                                           13->32 per group and tiled 8x
           w1w_ref    : (250, 32)   bf16  linear1 word-embedding rows
           b1/w2/b2   : f32 MLP head parameters
           out_ref    : (8, 8)      f32   logits."""
        segmask = segmask_ref[...]                                   # (B, N)
        # word-embedding half of linear1, all examples in one matmul
        hdn = jnp.dot(wemb_ref[...], w1w_ref[...],
                      preferred_element_type=jnp.float32) + b1_ref[...]  # (B, H)

        for g in range(WINDOW_CONTEXT):
            # grouped Conv2d for context word g: ONE MXU matmul (bias folded).
            acc = jnp.dot(convmat_ref[g], rhs_ref[g],
                          preferred_element_type=jnp.float32)        # (400, N)
            # MaxPool3d part 1: max over the 20 filters x 20 conv rows.
            m = jnp.max(acc, axis=0, keepdims=True)                  # (1, N)
            # MaxPool3d part 2: 20-wide stride-1 sliding max along w via a
            # full-width circular-roll log-doubling chain (XLU).  Wraparound
            # only pollutes lanes with local offset >= POOL_W(=13), which are
            # multiplied by zero rows of q below -- never read.
            for s in shifts:
                m = jnp.maximum(m, pltpu.roll(m, s, axis=1))
            # LeakyReLU AFTER the max reductions (monotone => commutes).
            m = jnp.where(m > 0, m, jnp.float32(0.01) * m)
            # Scatter the lane-(b, w) pooled values straight into the hidden
            # accumulator: sublane broadcast * segment mask, then one MXU
            # matmul against the tiled zero-padded pooled rows of linear1.
            masked = (segmask * m).astype(jnp.bfloat16)              # (B, N)
            hdn = hdn + jnp.dot(masked, q_ref[g],
                                preferred_element_type=jnp.float32)  # (B, H)

        hdn = jnp.tanh(hdn)
        out_ref[...] = jnp.dot(hdn, w2_ref[...],
                               preferred_element_type=jnp.float32) + b2_ref[...]

    return cnn_mlp_kernel


def make_forward(roll_like_jnp: bool):
    kernel = make_kernel(roll_like_jnp)

    def _full_spec(shape):
        n = len(shape)
        return pl.BlockSpec(tuple(shape), lambda i, _n=n: (0,) * _n)

    @jax.jit
    def forward(rhs, wemb, segmask, convmat, q, w1w, b1, w2, b2):
        args = (rhs, wemb, segmask, convmat, q, w1w, b1, w2, b2)
        return pl.pallas_call(
            kernel,
            out_shape=jax.ShapeDtypeStruct((BATCH, NUM_LABELS), jnp.float32),
            grid_spec=pltpu.PrefetchScalarGridSpec(
                num_scalar_prefetch=0,
                grid=(1,),                           # single step: N=256 lanes
                in_specs=[_full_spec(a.shape) for a in args],
                out_specs=_full_spec((BATCH, NUM_LABELS)),
            ),
            compiler_params=pltpu.CompilerParams(
                dimension_semantics=("arbitrary",)),
        )(*args)

    return forward


# ------------------------ glue: parameter preprocessing ----------------------
def build_conv_matrix(conv_w, conv_b):
    """Banded grouped-conv weights: only the 400 rows (f, h<20) the MaxPool can
    read, 3 kernel-column shifts packed along K (k = j*24 + c), and the conv
    bias folded in as an extra K column (paired with the rhs ones row)."""
    conv_w = np.asarray(conv_w, np.float32)                  # (100, 1, 3, 3)
    conv_b = np.asarray(conv_b, np.float32)                  # (100,)
    convmat = np.zeros((WINDOW_CONTEXT, ROWS, K_DIM), np.float32)
    for g in range(WINDOW_CONTEXT):
        for f in range(FILTER_NUM):
            for h in range(WORD_LEN):
                r = f * WORD_LEN + h
                for i in range(WINDOW_SIZE):
                    for j in range(WINDOW_SIZE):
                        convmat[g, r, j * H_PAD + h + i] = \
                            conv_w[g * FILTER_NUM + f, 0, i, j]
                convmat[g, r, K_IM2COL] = conv_b[g * FILTER_NUM + f]
    return jnp.asarray(convmat, jnp.bfloat16)


def build_conv_rhs(chars_pad):
    """Layout plumbing: pre-shift the padded char embeddings so each group's
    conv is one lane-dense (400,73)@(73,256) matmul; lane = b*32 + w, and the
    last K row is all-ones (folded bias)."""
    cols = jnp.stack([chars_pad[:, :, :, j:j + CONV_W]
                      for j in range(WINDOW_SIZE)], axis=2)   # (B,5,3,24,32)
    rhs = cols.reshape(BATCH, WINDOW_CONTEXT, K_IM2COL, CONV_W)  # K = j*24 + c
    rhs = rhs.transpose(1, 2, 0, 3).reshape(
        WINDOW_CONTEXT, K_IM2COL, N_LANES)                    # lane = b*32 + w
    ones = jnp.ones((WINDOW_CONTEXT, 1, N_LANES), rhs.dtype)
    return jnp.concatenate([rhs, ones], axis=1).astype(jnp.bfloat16)  # (5,73,256)


def split_linear1(w1):
    """Split linear1 (315,H) into
       q   (5,256,H): pooled-feature rows, zero-padded 13->32 per group and
                      tiled 8x along lanes so (segmask*m) @ q[g] lands every
                      example's pooled contribution on its own output row;
       w1w (250,H)  : word-embedding rows, matching wemb's (B,250) flatten."""
    w1 = np.asarray(w1, np.float32)                          # (315, H)
    q = np.zeros((WINDOW_CONTEXT, N_LANES, HIDDEN_DIM), np.float32)
    w1w = np.zeros((FEAT_WORD, HIDDEN_DIM), np.float32)
    for g in range(WINDOW_CONTEXT):
        wp = w1[g * PER_CTX: g * PER_CTX + POOL_W]           # (13, H)
        w1w[g * EMBED_DIM:(g + 1) * EMBED_DIM] = \
            w1[g * PER_CTX + POOL_W:(g + 1) * PER_CTX]
        for b in range(BATCH):
            q[g, b * CONV_W: b * CONV_W + POOL_W] = wp
    return jnp.asarray(q, jnp.bfloat16), jnp.asarray(w1w, jnp.bfloat16)


def build_segment_mask():
    m = np.zeros((BATCH, N_LANES), np.float32)
    for b in range(BATCH):
        m[b, b * CONV_W:(b + 1) * CONV_W] = 1.0
    return jnp.asarray(m)


# ------------------------------ pure-JAX reference ---------------------------
def reference_forward(x, char_tab, word_tab, conv_w, conv_b, w1, b1, w2, b2):
    out_word = word_tab[x[:, :, -1]]                         # (B, 5, 50)
    out_chars = char_tab[x[:, :, :WORD_LEN]]                 # (B, 5, 20, 30)
    conv = jax.lax.conv_general_dilated(
        out_chars, conv_w, window_strides=(1, 1),
        padding=((PAD, PAD), (PAD, PAD)),
        dimension_numbers=('NCHW', 'OIHW', 'NCHW'),
        feature_group_count=WINDOW_CONTEXT)
    conv = conv + conv_b[None, :, None, None]                # (B, 100, 22, 32)
    conv = jnp.where(conv > 0, conv, 0.01 * conv)            # LeakyReLU
    pooled = jax.lax.reduce_window(                          # MaxPool3d on 4-D
        conv, -jnp.inf, jax.lax.max,
        window_dimensions=(1, WORD_LEN, WORD_LEN, WORD_LEN),
        window_strides=(1, FILTER_NUM, WINDOW_SIZE, 1),
        padding='VALID')                                     # (B, 5, 1, 13)
    pooled = jnp.squeeze(jnp.transpose(pooled, (0, 1, 3, 2)), axis=3)
    feat = jnp.concatenate([pooled, out_word], axis=2).reshape(x.shape[0], -1)
    hdn = jnp.tanh(feat @ w1 + b1)
    return hdn @ w2 + b2


# ----------------------------------- main ------------------------------------
if __name__ == "__main__":
    key = jax.random.PRNGKey(0)
    ks = jax.random.split(key, 10)

    # deterministic synthetic parameters (shapes per CnnMLPSubWords.__init__)
    bound = sqrt(3.0 / CHAR_EMBED_DIM)
    char_tab = jax.random.uniform(ks[0], (CHARS_NUM, CHAR_EMBED_DIM),
                                  jnp.float32, -bound, bound)
    char_tab = char_tab.at[PAD_CHAR_IDX].set(0.0)            # padding_idx
    word_tab = jax.random.normal(ks[1], (VOCAB_SIZE, EMBED_DIM), jnp.float32) * 0.1
    conv_w = jax.random.normal(
        ks[2], (FILTER_NUM * WINDOW_CONTEXT, 1, WINDOW_SIZE, WINDOW_SIZE),
        jnp.float32) * 0.1
    conv_b = jax.random.normal(ks[3], (FILTER_NUM * WINDOW_CONTEXT,), jnp.float32) * 0.1
    w1 = jax.random.normal(ks[4], (FEAT_DIM, HIDDEN_DIM), jnp.float32) * 0.05
    b1 = jax.random.normal(ks[5], (HIDDEN_DIM,), jnp.float32) * 0.05
    w2 = jax.random.normal(ks[6], (HIDDEN_DIM, NUM_LABELS), jnp.float32) * 0.05
    b2 = jax.random.normal(ks[7], (NUM_LABELS,), jnp.float32) * 0.05

    # input x: (B, 5 context words, 20 char ids + 1 word id)
    chars_idx = jax.random.randint(ks[8], (BATCH, WINDOW_CONTEXT, WORD_LEN),
                                   0, CHARS_NUM)
    words_idx = jax.random.randint(ks[9], (BATCH, WINDOW_CONTEXT, 1),
                                   0, VOCAB_SIZE)
    x = jnp.concatenate([chars_idx, words_idx], axis=2).astype(jnp.int32)

    # glue: embedding lookups (gather) + im2col layout prep stay in JAX
    # TODO(synk): the embedding gathers themselves are done in JAX, not in-kernel.
    chars_emb = char_tab[x[:, :, :WORD_LEN]]                 # (B, 5, 20, 30)
    chars_pad = jnp.pad(chars_emb, ((0, 0), (0, 0), (PAD, PAD), (PAD, PAD)))
    rhs = build_conv_rhs(chars_pad)                          # (5, 73, 256) bf16
    wemb = word_tab[x[:, :, -1]].reshape(BATCH, FEAT_WORD).astype(jnp.bfloat16)
    convmat = build_conv_matrix(conv_w, conv_b)              # (5, 400, 73) bf16
    q, w1w = split_linear1(w1)                               # (5,256,32), (250,32)
    segmask = build_segment_mask()                           # (8, 256) f32

    forward = make_forward(_roll_matches_jnp())
    out = forward(rhs, wemb, segmask, convmat, q, w1w,
                  b1.reshape(1, -1), w2, b2.reshape(1, -1))
    out = jax.block_until_ready(out)

    ref = reference_forward(x, char_tab, word_tab, conv_w, conv_b,
                            w1, b1, w2, b2)
    np.testing.assert_allclose(np.asarray(out), np.asarray(ref),
                               rtol=1e-2, atol=1e-2)
    print("KERNEL_OK")
</pallas_src>

<mosaic_0001>
module attributes {stable_mosaic.version = 11 : i64} {
  func.func @k(%arg0: memref<1x256xf32, #tpu.memory_space<vmem>>, %arg1: memref<1x256xf32, #tpu.memory_space<vmem>>) attributes {dimension_semantics = [], scalar_prefetch = 0 : i64, scratch_operands = 0 : i64, tpu.core_type = #tpu.core_type<tc>} {
    %c0 = arith.constant 0 : index
    %c0_0 = arith.constant 0 : index
    %0 = vector.load %arg0[%c0, %c0_0] : memref<1x256xf32, #tpu.memory_space<vmem>>, vector<1x256xf32>
    %c1_i32 = arith.constant 1 : i32
    %1 = tpu.dynamic_rotate %0 by %c1_i32 dim 1 : vector<1x256xf32>, i32 -> vector<1x256xf32>
    %c0_1 = arith.constant 0 : index
    %c0_2 = arith.constant 0 : index
    %2 = vector.load %arg1[%c0_1, %c0_2] : memref<1x256xf32, #tpu.memory_space<vmem>>, vector<1x256xf32>
    tpu.vector_store %arg1[%c0_1, %c0_2], %1 {strides = array<i32>} : memref<1x256xf32, #tpu.memory_space<vmem>>, vector<1x256xf32>,
    return
  }
}

</mosaic_0001>

<bundles_post_ra>
// kernel: tpu_custom_call.1
= control target key start
LH: loop header
LB: loop body
LE: loop exit
PB: predicated region body
PF: predicated region fallthrough
CT: control target
= control target key end

     0   :  { %6 = vsyncpa [#allocation3], 0  ;;  %s148_s0 = inlined_call_operand.hbm [shape: f32[1,256], index: 0, kind: input, shape index: {}]   ;;  %s149_s1 = inlined_call_operand.hbm [shape: f32[1,256], index: 1, kind: output, shape index: {}]  }
   0x1   :  { %7 = vsyncpa [#allocation4], 0  ;;  %s128_s6 = smov [#allocation2]  }
   0x2   :  { %s14_s7 = sshll.u32 %s128_s6, 4  ;;  %s15_s7 = int_to_ptr.vmem [resolvable:$true] %s14_s7 }
   0x3   :  { %s92_s8 = scalar_lea.vmem %s15_s7, 32  ;;  %p97_p1 = scmp.lt.s32.totalorder %s15_s7, %s15_s7 }
   0x4   :  { %p93_p0 = scmp.ne.s32.totalorder %s15_s7, %s92_s8  ;;  %p98_p2 = scmp.lt.s32.totalorder %s92_s8, %s92_s8 }
   0x6   :  { %p99_p3 = por %p98_p2, %p97_p1 }
   0x8   :  { %p100_p4 = pnand %p99_p3, %p93_p0 }
   0xa   :  { %103 = shalt.err (!%p100_p4)
}
   0xb   :  { %17 = dma.hbm_to_vmem [thread:$0]  %s148_s0, 32, %s15_s7, [#allocation3]  }
   0xc   :  { %124 = dma.done.wait [#allocation3], 32  }
   0xd   :  { %125 = vsyncadd [#allocation3], 4294967264  ;;  %v23_v0 = vlaneseq  ;;  %v21_v4 = vld [vmem:[#allocation2] sm:$0x3]  ;;  %s129_s11 = smov 1   ;;  %s131_s0 = smov [#allocation5]  }
   0xe   :  { %v130_v7 = vmov 1966171168   ;;  %s71_s12 = sshll.u32 %s131_s0, 4  ;;  %s72_s12 = int_to_ptr.vmem [resolvable:$true] %s71_s12 }
   0xf   :  { %v24_v1 = vshrl.u32 %v23_v0, 7  ;;  %v46_v8 = vunpack.c.l.s4 %v130_v7  ;;  %v38_v9 = vand.u32 127, %v23_v0  ;;  %vm62_vm1 = vcmp.lt.s32.totalorder %v23_v0, 256  ;;  %s104_s13 = scalar_lea.vmem %s72_s12, 32  ;;  %p109_p6 = scmp.lt.s32.totalorder %s72_s12, %s72_s12 }
  0x10   :  { %p105_p5 = scmp.ne.s32.totalorder %s72_s12, %s104_s13  ;;  %p110_p7 = scmp.lt.s32.totalorder %s104_s13, %s104_s13 }
  0x11   :  { %v25_v2 = vsub.s32 0, %v24_v1  ;;  %v29_v3 = vsub.s32 1, %v24_v1  ;;  %v47_v11 = vunpack.c.0.s8 %v46_v8  ;;  %vm39_vm0 = vcmp.lt.s32.totalorder %v38_v9, 1 }
  0x12   :  { %p111_p8 = por %p110_p7, %p109_p6 }
  0x13   :  { %v26_v5 = vrot.slane %v21_v4, %v25_v2  ;;  %v30_v6 = vrot.slane %v21_v4, %v29_v3  ;;  %v50_v12 = vsub.s32 %v47_v11, %v24_v1 }
  0x14   :  { %p112_p9 = pnand %p111_p8, %p105_p5 }
  0x15   :  { %33 = vrot.lane.b32.xlu0 %v26_v5, %s129_s11 }
  0x19   :  { %35 = vrot.lane.b32.xlu0 %v30_v6, %s129_s11 }
  0x87   :  { %v34_v10 = vpop.permute.xlu0 %33 }
  0x8b   :  { %v36_v13 = vpop.permute.xlu0 %35 }
  0x8c   :  { %v40_v14 = vsel %vm39_vm0, %v34_v10, %v36_v13  ;;  %v41_v15 = vsel %vm39_vm0, %v36_v13, %v34_v10 }
  0x8d   :  { %v44_v16 = vcombine.low %v41_v15, %v40_v14 }
  0x8f   :  { %v51_v17 = vrot.slane %v44_v16, %v50_v12 }
  0x91   :  { %v58_v18 = vrot.slane %v51_v17, %v50_v12 }
  0x93   :  { %64 = vst.msk [vmem:[#allocation5] sm:$0x3] %vm62_vm1, %v58_v18 }
  0x94   :  { %115 = shalt.err (!%p112_p9)
}
  0x95   :  { %74 = dma.vmem_to_hbm [thread:$0]  %s72_s12, 32, %s149_s1, [#allocation4]  }
  0x96   :  { %126 = dma.done.wait [#allocation4], 32  }
  0x97   :  { %127 = vsyncadd [#allocation4], 4294967264 }
  0x98   :  { %78 = vsyncpa [#allocation3], 1 }
  0x99   :  { %79 = vsyncpa [#allocation4], 1 }

</bundles_post_ra>
